<compile_context>
chip_gen: v7x
topology: tpu7x:2x2x1
jax: 0.10.0
libtpu: 0.0.40
codegen_flags: <defaults>
</compile_context>

<pallas_src>
import functools

import jax
import jax.numpy as jnp
from jax.experimental import pallas as pl
from jax.experimental.pallas import tpu as pltpu

_LANES = 128
_ACC_ROWS = 64            # wide f32 VMEM accumulator: (64, 128) = 32 KiB each
_BLOCK_ROWS = 8192        # streaming block: 8192 x 128 f32 = 4 MiB per input


def _sq_sums(o, t):
    """f32 (block_rows,128) tiles -> ((64,128) sum((o-t)^2), (64,128) sum(o^2)).

    Pure VPU adds over the leading axis (tile-aligned reshape stays a view);
    no cross-lane work here.
    """
    diff = o - t
    sq = jnp.sum((diff * diff).reshape(-1, _ACC_ROWS, _LANES), axis=0)
    o2 = jnp.sum((o * o).reshape(-1, _ACC_ROWS, _LANES), axis=0)
    return sq, o2


def _loss_kernel_small(o_ref, t_ref, out_ref, *, n_elem, mu):
    """Single whole-array block: compute the loss directly."""
    o = o_ref[...].astype(jnp.float32)
    t = t_ref[...].astype(jnp.float32)
    diff = o - t
    sum_sq = jnp.sum(diff * diff)
    sum_o2 = jnp.sum(o * o)
    out_ref[0, 0] = (sum_sq / jnp.float32(n_elem)
                     + jnp.float32(mu * 0.5) * sum_o2)


def _loss_kernel_stream(o_ref, t_ref, out_ref, acc_sq_ref, acc_o2_ref, *,
                        n_elem, mu, tail_rows):
    """Streaming reduction over (8192, 128) blocks with wide VMEM accumulators."""
    j = pl.program_id(0)
    nb = pl.num_programs(0)

    @pl.when(j == 0)
    def _():
        acc_sq_ref[...] = jnp.zeros_like(acc_sq_ref)
        acc_o2_ref[...] = jnp.zeros_like(acc_o2_ref)

    def full_block():
        sq, o2 = _sq_sums(o_ref[...].astype(jnp.float32),
                          t_ref[...].astype(jnp.float32))
        acc_sq_ref[...] += sq
        acc_o2_ref[...] += o2

    def tail_block():
        # Rows >= tail_rows hold stale VMEM (possibly NaN/Inf bit patterns):
        # select BEFORE squaring so 0 * NaN never reaches the accumulators.
        row_ids = jax.lax.broadcasted_iota(jnp.int32, (_BLOCK_ROWS, _LANES), 0)
        mask = row_ids < tail_rows
        o = jnp.where(mask, o_ref[...].astype(jnp.float32), 0.0)
        t = jnp.where(mask, t_ref[...].astype(jnp.float32), 0.0)
        sq, o2 = _sq_sums(o, t)
        acc_sq_ref[...] += sq
        acc_o2_ref[...] += o2

    if tail_rows == 0:
        # Every block (incl. the last) is full: mask machinery never emitted.
        full_block()
    else:
        pl.when(j < nb - 1)(full_block)
        pl.when(j == nb - 1)(tail_block)

    # Epilogue: one cross-lane reduce, then the scalar loss math.
    @pl.when(j == nb - 1)
    def _():
        sum_sq = jnp.sum(acc_sq_ref[...])
        sum_o2 = jnp.sum(acc_o2_ref[...])
        out_ref[0, 0] = (sum_sq / jnp.float32(n_elem)
                         + jnp.float32(mu * 0.5) * sum_o2)


def strongly_convex_loss(outputs, targets, strong_convexity_param=0.1):
    """Pallas implementation of StronglyConvexLoss.forward (scalar f32)."""
    assert outputs.shape == targets.shape
    n_elem = int(outputs.size)
    mu = float(strong_convexity_param)

    # Flatten in native dtype and view as a lane-dense (rows, 128) slab.
    # For 128-divisible sizes this is a free bitcast reshape.
    # TODO(synk): ragged sizes still pay one pad copy in HBM; a zero-copy
    # element-granular mask would need a 1-D / manual-DMA input path.
    o_flat = jnp.ravel(outputs)
    t_flat = jnp.ravel(targets)
    n = o_flat.shape[0]
    pad = (-n) % _LANES
    if pad:
        o_flat = jnp.concatenate([o_flat, jnp.zeros((pad,), o_flat.dtype)])
        t_flat = jnp.concatenate([t_flat, jnp.zeros((pad,), t_flat.dtype)])
    rows = (n + pad) // _LANES
    o2d = o_flat.reshape(rows, _LANES)
    t2d = t_flat.reshape(rows, _LANES)

    if rows <= _BLOCK_ROWS:
        # Small input: single whole-array VMEM block, no grid, no masking
        # (padded rows are real zeros and contribute nothing).
        kernel = functools.partial(_loss_kernel_small, n_elem=n_elem, mu=mu)
        out = pl.pallas_call(
            kernel,
            out_shape=jax.ShapeDtypeStruct((1, 1), jnp.float32),
            in_specs=[
                pl.BlockSpec(memory_space=pltpu.MemorySpace.VMEM),
                pl.BlockSpec(memory_space=pltpu.MemorySpace.VMEM),
            ],
            out_specs=pl.BlockSpec(memory_space=pltpu.MemorySpace.SMEM),
            compiler_params=pltpu.CompilerParams(
                vmem_limit_bytes=32 * 1024 * 1024),
        )(o2d, t2d)
        return out[0, 0]

    # Large input: stream 8192x128 blocks (auto-pipelined, double-buffered),
    # accumulate into wide VMEM scratch, reduce once in the epilogue.
    num_blocks = pl.cdiv(rows, _BLOCK_ROWS)
    tail_rows = rows % _BLOCK_ROWS        # 0 => last block is also full
    kernel = functools.partial(_loss_kernel_stream, n_elem=n_elem, mu=mu,
                               tail_rows=tail_rows)
    out = pl.pallas_call(
        kernel,
        out_shape=jax.ShapeDtypeStruct((1, 1), jnp.float32),
        grid_spec=pltpu.PrefetchScalarGridSpec(
            num_scalar_prefetch=0,
            grid=(num_blocks,),
            in_specs=[
                pl.BlockSpec((_BLOCK_ROWS, _LANES), lambda j: (j, 0)),
                pl.BlockSpec((_BLOCK_ROWS, _LANES), lambda j: (j, 0)),
            ],
            out_specs=pl.BlockSpec(
                (1, 1), lambda j: (0, 0),
                memory_space=pltpu.MemorySpace.SMEM),
            scratch_shapes=[
                pltpu.VMEM((_ACC_ROWS, _LANES), jnp.float32),
                pltpu.VMEM((_ACC_ROWS, _LANES), jnp.float32),
            ],
        ),
        compiler_params=pltpu.CompilerParams(
            dimension_semantics=("arbitrary",),
            vmem_limit_bytes=32 * 1024 * 1024,
        ),
    )(o2d, t2d)
    return out[0, 0]


def _reference(outputs, targets, mu):
    o = outputs.astype(jnp.float32)
    t = targets.astype(jnp.float32)
    return jnp.mean((o - t) ** 2) + (mu / 2.0) * jnp.sum(o * o)


if __name__ == "__main__":
    key = jax.random.PRNGKey(0)
    k1, k2, k3, k4, k5, k6 = jax.random.split(key, 6)

    # 1) Small NCHW-like prediction/target tensors (exact (16,128) slab).
    mu = 0.1  # class __init__ default strong_convexity_param
    shape = (2, 4, 16, 16)
    o = jax.random.normal(k1, shape, dtype=jnp.float32)
    t = jax.random.normal(k2, shape, dtype=jnp.float32)
    loss = jax.block_until_ready(strongly_convex_loss(o, t, mu))
    ref = _reference(o, t, mu)
    assert jnp.allclose(loss, ref, rtol=1e-5, atol=1e-5), (loss, ref)

    # 2) Ragged size (exercises the wrapper pad + zero tail rows).
    mu2 = 0.25
    shape2 = (3, 5, 7, 11)
    o2 = jax.random.normal(k3, shape2, dtype=jnp.float32)
    t2 = jax.random.normal(k4, shape2, dtype=jnp.float32)
    loss2 = jax.block_until_ready(strongly_convex_loss(o2, t2, mu2))
    ref2 = _reference(o2, t2, mu2)
    assert jnp.allclose(loss2, ref2, rtol=1e-5, atol=1e-5), (loss2, ref2)

    # 3) Streaming path: >8192 rows so the grid, accumulators, fast path and
    #    masked tail block are all exercised (rows=10240, tail=2048).
    mu3 = 0.05
    shape3 = (1280, 1024)
    o3 = jax.random.normal(k5, shape3, dtype=jnp.float32)
    t3 = jax.random.normal(k6, shape3, dtype=jnp.float32)
    loss3 = jax.block_until_ready(strongly_convex_loss(o3, t3, mu3))
    ref3 = _reference(o3, t3, mu3)
    assert jnp.allclose(loss3, ref3, rtol=1e-4, atol=1e-4), (loss3, ref3)

    print("KERNEL_OK")
</pallas_src>

<mosaic_0001>
module attributes {stable_mosaic.version = 11 : i64} {
  func.func @_loss_kernel_small(%arg0: memref<16x128xf32, #tpu.memory_space<vmem>>, %arg1: memref<16x128xf32, #tpu.memory_space<vmem>>, %arg2: memref<1x1xf32, #tpu.memory_space<smem>>) attributes {dimension_semantics = [], scalar_prefetch = 0 : i64, scratch_operands = 0 : i64, tpu.core_type = #tpu.core_type<tc>} {
    %c0 = arith.constant 0 : index
    %c0_0 = arith.constant 0 : index
    %0 = vector.load %arg0[%c0, %c0_0] : memref<16x128xf32, #tpu.memory_space<vmem>>, vector<16x128xf32>
    %c0_1 = arith.constant 0 : index
    %c0_2 = arith.constant 0 : index
    %1 = vector.load %arg1[%c0_1, %c0_2] : memref<16x128xf32, #tpu.memory_space<vmem>>, vector<16x128xf32>
    %2 = arith.subf %0, %1 : vector<16x128xf32>
    %3 = arith.mulf %2, %2 : vector<16x128xf32>
    %4 = vector.shape_cast %3 : vector<16x128xf32> to vector<1x16x128xf32>
    %cst = arith.constant dense<0.000000e+00> : vector<1xf32>
    %5 = vector.multi_reduction <add>, %4, %cst [1, 2] : vector<1x16x128xf32> to vector<1xf32>
    %6 = vector.shape_cast %5 : vector<1xf32> to vector<1x1x1xf32>
    %7 = vector.extract %6[0, 0, 0] : f32 from vector<1x1x1xf32>
    %8 = arith.mulf %0, %0 : vector<16x128xf32>
    %9 = vector.shape_cast %8 : vector<16x128xf32> to vector<1x16x128xf32>
    %cst_3 = arith.constant dense<0.000000e+00> : vector<1xf32>
    %10 = vector.multi_reduction <add>, %9, %cst_3 [1, 2] : vector<1x16x128xf32> to vector<1xf32>
    %11 = vector.shape_cast %10 : vector<1xf32> to vector<1x1x1xf32>
    %12 = vector.extract %11[0, 0, 0] : f32 from vector<1x1x1xf32>
    %cst_4 = arith.constant 2.048000e+03 : f32
    %13 = arith.divf %7, %cst_4 : f32
    %cst_5 = arith.constant 5.000000e-02 : f32
    %14 = arith.mulf %cst_5, %12 : f32
    %15 = arith.addf %13, %14 : f32
    %c0_6 = arith.constant 0 : index
    %c0_7 = arith.constant 0 : index
    %16 = memref.load %arg2[%c0_6, %c0_7] : memref<1x1xf32, #tpu.memory_space<smem>>
    memref.store %15, %arg2[%c0_6, %c0_7] : memref<1x1xf32, #tpu.memory_space<smem>>
    return
  }
}

</mosaic_0001>

<bundles_post_ra>
// kernel: tpu_custom_call.1
= control target key start
LH: loop header
LB: loop body
LE: loop exit
PB: predicated region body
PF: predicated region fallthrough
CT: control target
= control target key end

     0   :  { %7 = vsyncpa [#allocation3], 0  ;;  %s217_s0 = inlined_call_operand.hbm [shape: f32[16,128], index: 0, kind: input, shape index: {}]   ;;  %s218_s1 = inlined_call_operand.hbm [shape: f32[16,128], index: 1, kind: input, shape index: {}]   ;;  %s219_s2 = inlined_call_operand.hbm [shape: f32[1,1], index: 2, kind: output, shape index: {}]  }
   0x1   :  { %8 = vsyncpa [#allocation6], 0 }
   0x2   :  { %9 = vsyncpa [#allocation4], 0  ;;  %s161_s9 = smov [#allocation2]   ;;  %s101_s13 = scalar_lea.hbm %s217_s0, 256 }
   0x3   :  { %s15_s10 = sshll.u32 %s161_s9, 4  ;;  %p102_p0 = scmp.ne.s32.totalorder %s217_s0, %s101_s13  ;;  %s16_s10 = int_to_ptr.vmem [resolvable:$true] %s15_s10 }
   0x4   :  { %p105_p1 = scmp.lt.u32.totalorder %s101_s13, %s217_s0 }
   0x6   :  { %p107_p2 = pnand %p105_p1, %p102_p0 }
   0x8   :  { %110 = shalt.err (!%p107_p2)
}
   0x9   :  { %s111_s18 = scalar_lea.vmem %s16_s10, 256  ;;  %p116_p4 = scmp.lt.s32.totalorder %s16_s10, %s16_s10 }
   0xa   :  { %p112_p3 = scmp.ne.s32.totalorder %s16_s10, %s111_s18  ;;  %p117_p5 = scmp.lt.s32.totalorder %s111_s18, %s111_s18 }
   0xc   :  { %p118_p6 = por %p117_p5, %p116_p4 }
   0xe   :  { %p119_p7 = pnand %p118_p6, %p112_p3 }
  0x10   :  { %122 = shalt.err (!%p119_p7)
}
  0x11   :  { %s162_s19 = smov 128   ;;  %s163_s20 = smov 8  }
  0x12   :  { %21 = dma.hbm_to_vmem [thread:$0]  %s217_s0, 256, %s16_s10, [#allocation3], %s162_s19, %s162_s19, %s163_s20  }
  0x13   :  { %s164_s23 = smov [#allocation5]   ;;  %s123_s27 = scalar_lea.hbm %s218_s1, 256 }
  0x14   :  { %s27_s24 = sshll.u32 %s164_s23, 4  ;;  %p124_p8 = scmp.ne.s32.totalorder %s218_s1, %s123_s27  ;;  %s28_s24 = int_to_ptr.vmem [resolvable:$true] %s27_s24 }
  0x15   :  { %p127_p9 = scmp.lt.u32.totalorder %s123_s27, %s218_s1 }
  0x17   :  { %p129_p10 = pnand %p127_p9, %p124_p8 }
  0x19   :  { %132 = shalt.err (!%p129_p10)
}
  0x1a   :  { %s133_s4 = scalar_lea.vmem %s28_s24, 256  ;;  %p138_p12 = scmp.lt.s32.totalorder %s28_s24, %s28_s24 }
  0x1b   :  { %p134_p11 = scmp.ne.s32.totalorder %s28_s24, %s133_s4  ;;  %p139_p13 = scmp.lt.s32.totalorder %s133_s4, %s133_s4 }
  0x1d   :  { %p140_p0 = por %p139_p13, %p138_p12 }
  0x1f   :  { %p141_p1 = pnand %p140_p0, %p134_p11 }
  0x21   :  { %144 = shalt.err (!%p141_p1)
}
  0x22   :  { %33 = dma.hbm_to_vmem [thread:$0]  %s218_s1, 256, %s28_s24, [#allocation6], %s162_s19, %s162_s19, %s163_s20  }
  0x23   :  { %155 = dma.done.wait [#allocation3], 256  }
  0x24   :  { %156 = vsyncadd [#allocation3], 4294967040 }
  0x25   :  { %157 = dma.done.wait [#allocation6], 256  }
  0x26   :  { %158 = vsyncadd [#allocation6], 4294967040  ;;  %v40_v0 = vld [vmem:[#allocation2] sm:$0xff]  ;;  %v41_v1 = vld [vmem:[#allocation2 + $0x8] sm:$0xff]  ;;  %s145_s12 = scalar_lea.hbm %s219_s2, 16 }
  0x27   :  { %v42_v2 = vld [vmem:[#allocation5] sm:$0xff]  ;;  %v43_v3 = vld [vmem:[#allocation5 + $0x8] sm:$0xff]  ;;  %v58_v8 = vmul.f32 %v40_v0, %v40_v0  ;;  %v59_v9 = vmul.f32 %v41_v1, %v41_v1  ;;  %p146_p2 = scmp.ne.s32.totalorder %s219_s2, %s145_s12  ;;  %p149_p3 = scmp.lt.u32.totalorder %s145_s12, %s219_s2 }
  0x28   :  { %v44_v4 = vsub.f32 %v40_v0, %v42_v2  ;;  %v45_v5 = vsub.f32 %v41_v1, %v43_v3 }
  0x29   :  { %v60_v11 = vadd.f32 %v59_v9, %v58_v8  ;;  %p151_p4 = pnand %p149_p3, %p146_p2 }
  0x2a   :  { %v46_v6 = vmul.f32 %v44_v4, %v44_v4  ;;  %v47_v7 = vmul.f32 %v45_v5, %v45_v5 }
  0x2c   :  { %v48_v10 = vadd.f32 %v47_v7, %v46_v6 }
  0x2e   :  { %49 = vadd.xlane.f32.xlu0 %v48_v10 }
  0x32   :  { %61 = vadd.xlane.f32.xlu0 %v60_v11 }
  0xbb   :  { %v50_v12 = vpop.xlane.xlu0 %49 }
  0xbc   :  { %v51_v13 = vrot.slane %v50_v12, 4 }
  0xbe   :  { %v52_v14 = vadd.f32 %v51_v13, %v50_v12 }
  0xbf   :  { %v62_v15 = vpop.xlane.xlu0 %61 }
  0xc0   :  { %v53_v16 = vrot.slane %v52_v14, 2  ;;  %v63_v17 = vrot.slane %v62_v15, 4 }
  0xc2   :  { %v64_v18 = vadd.f32 %v63_v17, %v62_v15  ;;  %v54_v19 = vadd.f32 %v53_v16, %v52_v14 }
  0xc4   :  { %v65_v20 = vrot.slane %v64_v18, 2  ;;  %v55_v21 = vrot.slane %v54_v19, 1 }
  0xc6   :  { %v66_v22 = vadd.f32 %v65_v20, %v64_v18  ;;  %v56_v23 = vadd.f32 %v55_v21, %v54_v19 }
  0xc8   :  { %92 = vpush %v56_v23  ;;  %v67_v24 = vrot.slane %v66_v22, 1 }
  0xca   :  { %v68_v25 = vadd.f32 %v67_v24, %v66_v22 }
  0xcc   :  { %94 = vpush %v68_v25 }
  0xf9   :  { %s93_s1 = spop %92 }
  0xfa   :  { %s72_s6 = smul.f32 0.00048828125, %s93_s1 }
  0xfd   :  { %s95_s7 = spop %94 }
  0xfe   :  { %s73_s8 = smul.f32 0.05, %s95_s7 }
 0x100   :  { %s74_s9 = sadd.f32 %s73_s8, %s72_s6 }
 0x102   :  { %76 = sst [smem:[#allocation7]] %s74_s9 }
 0x103   :  { %154 = shalt.err (!%p151_p4)
}
 0x104   :  { %s165_s17 = smov [#allocation7]  }
 0x105   :  { %84 = dma.smem_to_hbm %s165_s17, 16, %s219_s2, [#allocation4]  }
 0x106   :  { %159 = dma.done.wait [#allocation4], 16  }
 0x107   :  { %160 = vsyncadd [#allocation4], 4294967280 }
 0x108   :  { %88 = sfence }
 0x109   :  { %89 = vsyncpa [#allocation3], 1 }
 0x10a   :  { %90 = vsyncpa [#allocation6], 1 }
 0x10b   :  { %91 = vsyncpa [#allocation4], 1 }

</bundles_post_ra>
